<compile_context>
chip_gen: v7x
topology: tpu7x:2x2x1
jax: 0.10.0
libtpu: 0.0.40
codegen_flags: <defaults>
</compile_context>

<pallas_src>
import jax
import jax.numpy as jnp
from jax.experimental import pallas as pl
from jax.experimental.pallas import tpu as pltpu

NEG_SLOPE = 0.01  # torch.nn.LeakyReLU default


def _round_up(x, m):
    return ((x + m - 1) // m) * m


def _vmem_budget_bytes():
    """Generation-aware VMEM budget (~80% of capacity, headroom for compiler
    scratch): ~51 MiB on v7x (64 MiB/TC), ~102 MiB on v5e/v6e (128 MiB)."""
    cap = 64 << 20  # conservative default if the query is unavailable
    try:
        info = pltpu.get_tpu_info()
        cap = int(getattr(info, "vmem_capacity_bytes", cap))
    except Exception:
        pass
    return (cap * 4) // 5


def _maybe_pad2(x, rows, cols):
    """Zero-pad a 2-D array up to (rows, cols); no-op (no HBM copy) if aligned."""
    pr, pc = rows - x.shape[0], cols - x.shape[1]
    if pr or pc:
        x = jnp.pad(x, ((0, pr), (0, pc)))
    return x


def _pick_row_tile(n, tm_req, tk, dout_p, g_bytes, budget):
    """Pick a row tile that (a) respects the sublane alignment, (b) fits the
    per-generation VMEM budget, (c) is balanced so padding waste < align."""
    align = 16 if g_bytes < 4 else 8            # bf16 packs 2 rows / sublane
    tm = max(align, (min(tm_req, _round_up(n, align)) // align) * align)
    while tm > align:
        footprint = (2 * tm * tk * g_bytes       # double-buffered G blocks
                     + 2 * tk * dout_p * g_bytes  # double-buffered h blocks
                     + 3 * tm * dout_p * 4        # f32 acc + 2x out blocks
                     + (2 << 20))                 # misc headroom
        if footprint <= budget:
            break
        tm = max(align, ((tm // 2) // align) * align)
    n_tiles = pl.cdiv(n, tm)
    tm = _round_up(pl.cdiv(n, n_tiles), align)    # balanced row tiles
    return tm, n_tiles


# --------------------------------------------------------------------------
# Kernels
# --------------------------------------------------------------------------
def fused_kernel(x_ref, w_ref, b_ref, g_ref, out_ref):
    # Small-problem path: both matmuls in one launch, h never leaves VMEM.
    h = jnp.dot(x_ref[...], w_ref[...], preferred_element_type=jnp.float32)
    h = h + b_ref[...]
    h = jnp.where(h > 0, h, NEG_SLOPE * h)
    out_ref[...] = jnp.dot(
        g_ref[...], h, preferred_element_type=jnp.float32
    ).astype(out_ref.dtype)


def linear_leaky_kernel(x_ref, w_ref, b_ref, h_ref):
    # h = LeakyReLU(x @ W + b), f32 accumulation on the MXU.
    h = jnp.dot(x_ref[...], w_ref[...], preferred_element_type=jnp.float32)
    h = h + b_ref[...]
    h_ref[...] = jnp.where(h > 0, h, NEG_SLOPE * h).astype(h_ref.dtype)


def propagate_kernel(g_ref, h_ref, out_ref, acc_ref):
    # out_tile = sum_k G[i, k] @ h[k]   (K-tiled, f32 VMEM accumulator)
    @pl.when(pl.program_id(1) == 0)
    def _():
        acc_ref[...] = jnp.zeros_like(acc_ref)

    acc_ref[...] += jnp.dot(
        g_ref[...], h_ref[...], preferred_element_type=jnp.float32
    )

    @pl.when(pl.program_id(1) == pl.num_programs(1) - 1)
    def _():
        out_ref[...] = acc_ref[...].astype(out_ref.dtype)


# --------------------------------------------------------------------------
# Wrapper
# --------------------------------------------------------------------------
def hgnn_conv(feats, G, weight_t, bias, *, tm=512, tk=512,
              g_dtype=jnp.float32, force_path=None):
    """HGNN_conv forward.

    feats: (N, Din) f32, G: (N, N) f32, weight_t: (Din, Dout) f32 (= W.T),
    bias: (1, Dout) f32.

    g_dtype=jnp.bfloat16 streams G and h through stage 2 in bf16 (f32 MXU
    accumulation, f32 output): ~2x less HBM/VMEM for the memory-bound
    propagation but slightly different numerics vs. the f32 reference (opt-in).
    force_path in {None, "fused", "tiled"} overrides the size gate (testing).
    """
    N, Din = feats.shape
    Dout = weight_t.shape[1]
    budget = _vmem_budget_bytes()

    # Lane-dense padding targets (multiples of 128 on lane dims).
    DIp = _round_up(Din, 128)
    DOp = _round_up(Dout, 128)
    TK = max(128, (min(tk, _round_up(N, 128)) // 128) * 128)
    NCp = _round_up(N, TK)                 # padded contraction dim (= h rows)

    feats_p = _maybe_pad2(feats, NCp, DIp)
    w_p = _maybe_pad2(weight_t, DIp, DOp)
    b_p = _maybe_pad2(bias, 1, DOp)
    # Correctness of the padding: padded G columns are zero, so the (bias-only,
    # nonzero) padded rows of h never contribute; padded output rows are sliced
    # off at the end.

    # ---- size-gated fused path (one launch, no h HBM round trip) ----------
    fused_bytes = 4 * (NCp * DIp + DIp * DOp + DOp + NCp * NCp + 2 * NCp * DOp)
    use_fused = (force_path == "fused") or (
        force_path is None and 2 * fused_bytes + (4 << 20) <= budget
        and NCp <= 2048)

    if use_fused:
        G_p = _maybe_pad2(G, NCp, NCp)
        out_p = pl.pallas_call(
            fused_kernel,
            out_shape=jax.ShapeDtypeStruct((NCp, DOp), jnp.float32),
            grid=(1,),
            in_specs=[
                pl.BlockSpec((NCp, DIp), lambda i: (0, 0)),
                pl.BlockSpec((DIp, DOp), lambda i: (0, 0)),
                pl.BlockSpec((1, DOp), lambda i: (0, 0)),
                pl.BlockSpec((NCp, NCp), lambda i: (0, 0)),
            ],
            out_specs=pl.BlockSpec((NCp, DOp), lambda i: (0, 0)),
            compiler_params=pltpu.CompilerParams(
                dimension_semantics=("arbitrary",),
                vmem_limit_bytes=budget,
            ),
            cost_estimate=pl.CostEstimate(
                flops=2 * NCp * DIp * DOp + 2 * NCp * NCp * DOp,
                transcendentals=0,
                bytes_accessed=fused_bytes,
            ),
        )(feats_p, w_p, b_p, G_p)
        # TODO(synk): Dropout(p=0.3) is identity here (eval mode); training-mode
        # stochastic mask (pltpu.prng_*) intentionally omitted for determinism.
        return out_p[:N, :Dout]

    # ---- tiled path --------------------------------------------------------
    h_dtype = jnp.dtype(g_dtype)
    g_bytes = h_dtype.itemsize

    # Stage 1: h = LeakyReLU(feats @ W + b), computed exactly once, row-tiled.
    TL = TK  # divides NCp by construction
    h = pl.pallas_call(
        linear_leaky_kernel,
        out_shape=jax.ShapeDtypeStruct((NCp, DOp), h_dtype),
        grid=(NCp // TL,),
        in_specs=[
            pl.BlockSpec((TL, DIp), lambda i: (i, 0)),
            # Weight/bias are resident (constant index) -> single-buffered.
            pl.BlockSpec((DIp, DOp), lambda i: (0, 0),
                         pipeline_mode=pl.Buffered(1)),
            pl.BlockSpec((1, DOp), lambda i: (0, 0),
                         pipeline_mode=pl.Buffered(1)),
        ],
        out_specs=pl.BlockSpec((TL, DOp), lambda i: (i, 0)),
        compiler_params=pltpu.CompilerParams(
            dimension_semantics=("parallel",),
            vmem_limit_bytes=budget,
        ),
        cost_estimate=pl.CostEstimate(
            flops=2 * NCp * DIp * DOp,
            transcendentals=0,
            bytes_accessed=(NCp * DIp + DIp * DOp + DOp) * 4
                           + NCp * DOp * g_bytes,
        ),
    )(feats_p, w_p, b_p)

    # Stage 2: out = G @ h, row-tiled ("parallel", megacore-shardable on v7x)
    # and K-tiled ("arbitrary", innermost) with an f32 accumulator scratch.
    TM, n_row_tiles = _pick_row_tile(N, tm, TK, DOp, g_bytes, budget)
    NRp = n_row_tiles * TM
    n_k = NCp // TK

    G_c = G.astype(h_dtype) if G.dtype != h_dtype else G
    G_p = _maybe_pad2(G_c, NRp, NCp)   # skipped entirely when already aligned
    # TODO(synk): for unaligned N the remainder pad of G is still a full HBM
    # copy; masking only the final partial K tile in-kernel would remove it.

    out_p = pl.pallas_call(
        propagate_kernel,
        out_shape=jax.ShapeDtypeStruct((NRp, DOp), jnp.float32),
        grid=(n_row_tiles, n_k),
        in_specs=[
            pl.BlockSpec((TM, TK), lambda i, k: (i, k)),    # G block
            pl.BlockSpec((TK, DOp), lambda i, k: (k, 0)),   # h K-slab
        ],
        out_specs=pl.BlockSpec((TM, DOp), lambda i, k: (i, 0)),
        scratch_shapes=[pltpu.VMEM((TM, DOp), jnp.float32)],
        compiler_params=pltpu.CompilerParams(
            dimension_semantics=("parallel", "arbitrary"),
            vmem_limit_bytes=budget,
        ),
        cost_estimate=pl.CostEstimate(
            flops=2 * NRp * NCp * DOp,
            transcendentals=0,
            bytes_accessed=(NRp * NCp + n_row_tiles * NCp * DOp) * g_bytes
                           + NRp * DOp * 4,
        ),
    )(G_p, h)

    # TODO(synk): Dropout(p=0.3) is identity here (eval mode); training-mode
    # stochastic mask (pltpu.prng_*) intentionally omitted for determinism.
    return out_p[:N, :Dout]


# --------------------------------------------------------------------------
# Self-test
# --------------------------------------------------------------------------
def reference(feats, G, weight_t, bias):
    h = jnp.dot(feats, weight_t, precision=jax.lax.Precision.HIGHEST) + bias
    h = jnp.where(h > 0, h, NEG_SLOPE * h)
    return jnp.dot(G, h, precision=jax.lax.Precision.HIGHEST)


def _make_case(key, n, din, dout):
    k_f, k_g, k_w, k_b = jax.random.split(key, 4)
    feats = jax.random.normal(k_f, (n, din), dtype=jnp.float32)
    G = jax.random.uniform(k_g, (n, n), dtype=jnp.float32)
    bound = 1.0 / (din ** 0.5)
    weight = jax.random.uniform(k_w, (dout, din), minval=-bound, maxval=bound,
                                dtype=jnp.float32)
    bias = jax.random.uniform(k_b, (1, dout), minval=-bound, maxval=bound,
                              dtype=jnp.float32)
    return feats, G, weight.T, bias        # weight stored pre-transposed


if __name__ == "__main__":
    k1, k2 = jax.random.split(jax.random.PRNGKey(0))

    # Case 1: module-typical small shapes -> fused single-launch path.
    feats, G, weight_t, bias = _make_case(k1, 16, 32, 32)
    out = jax.block_until_ready(hgnn_conv(feats, G, weight_t, bias))
    ref = reference(feats, G, weight_t, bias)
    assert out.shape == (16, 32)
    assert jnp.allclose(out, ref, atol=1e-4, rtol=1e-4), "fused path mismatch"

    # Case 2: unaligned shapes, forced tiled path (exercises K-tiled stage 2,
    # balanced TM, accumulator init/writeback, Buffered(1) residents).
    feats2, G2, weight_t2, bias2 = _make_case(k2, 300, 40, 24)
    out2 = jax.block_until_ready(
        hgnn_conv(feats2, G2, weight_t2, bias2, tm=128, tk=128,
                  force_path="tiled"))
    ref2 = reference(feats2, G2, weight_t2, bias2)
    assert out2.shape == (300, 24)
    assert jnp.allclose(out2, ref2, atol=1e-3, rtol=1e-4), "tiled path mismatch"

    # Case 3: opt-in bf16 streaming of G/h (f32 accumulation) -- precision
    # tradeoff flagged; validated against the f32 reference with a loose bound.
    out3 = jax.block_until_ready(
        hgnn_conv(feats2, G2, weight_t2, bias2, tm=128, tk=128,
                  g_dtype=jnp.bfloat16, force_path="tiled"))
    assert out3.shape == (300, 24)
    assert jnp.allclose(out3, ref2, atol=0.5, rtol=3e-2), "bf16 path mismatch"

    print("KERNEL_OK")
</pallas_src>

<mosaic_0001>
module attributes {stable_mosaic.version = 11 : i64} {
  func.func @fused_kernel(%arg0: i32, %arg1: memref<128x128xf32, #tpu.memory_space<vmem>>, %arg2: memref<128x128xf32, #tpu.memory_space<vmem>>, %arg3: memref<1x128xf32, #tpu.memory_space<vmem>>, %arg4: memref<128x128xf32, #tpu.memory_space<vmem>>, %arg5: memref<128x128xf32, #tpu.memory_space<vmem>>) attributes {dimension_semantics = [#tpu.dimension_semantics<arbitrary>], iteration_bounds = array<i64: 1>, scalar_prefetch = 0 : i64, scratch_operands = 0 : i64, tpu.core_type = #tpu.core_type<tc>, window_params = [{pipeline_mode = #tpu.pipeline_mode<synchronous>, transform_indices = @transform_0, window_bounds = array<i64: 128, 128>}, {pipeline_mode = #tpu.pipeline_mode<synchronous>, transform_indices = @transform_1, window_bounds = array<i64: 128, 128>}, {pipeline_mode = #tpu.pipeline_mode<synchronous>, transform_indices = @transform_2, window_bounds = array<i64: 1, 128>}, {pipeline_mode = #tpu.pipeline_mode<synchronous>, transform_indices = @transform_3, window_bounds = array<i64: 128, 128>}, {pipeline_mode = #tpu.pipeline_mode<synchronous>, transform_indices = @transform_4, window_bounds = array<i64: 128, 128>}]} {
    %c0 = arith.constant 0 : index
    %c0_0 = arith.constant 0 : index
    %0 = vector.load %arg1[%c0, %c0_0] : memref<128x128xf32, #tpu.memory_space<vmem>>, vector<128x128xf32>
    %c0_1 = arith.constant 0 : index
    %c0_2 = arith.constant 0 : index
    %1 = vector.load %arg2[%c0_1, %c0_2] : memref<128x128xf32, #tpu.memory_space<vmem>>, vector<128x128xf32>
    %cst = arith.constant dense<0.000000e+00> : vector<128x128xf32>
    %2 = tpu.matmul %0, %1, %cst {dimension_numbers = #tpu.dot_dimension_numbers<[1], [0], [0], [1], [0, 0, 1, 1], [], []>} : vector<128x128xf32>, vector<128x128xf32>, vector<128x128xf32> -> vector<128x128xf32>
    %c0_3 = arith.constant 0 : index
    %c0_4 = arith.constant 0 : index
    %3 = vector.load %arg3[%c0_3, %c0_4] : memref<1x128xf32, #tpu.memory_space<vmem>>, vector<1x128xf32>
    %4 = vector.broadcast %3 : vector<1x128xf32> to vector<128x128xf32>
    %5 = arith.addf %2, %4 : vector<128x128xf32>
    %cst_5 = arith.constant 0.000000e+00 : f32
    %6 = vector.broadcast %cst_5 : f32 to vector<128x128xf32>
    %7 = arith.cmpf ogt, %5, %6 : vector<128x128xf32>
    %cst_6 = arith.constant 0.00999999977 : f32
    %8 = vector.broadcast %cst_6 : f32 to vector<128x128xf32>
    %9 = arith.mulf %8, %5 : vector<128x128xf32>
    %10 = arith.select %7, %5, %9 : vector<128x128xi1>, vector<128x128xf32>
    %c0_7 = arith.constant 0 : index
    %c0_8 = arith.constant 0 : index
    %11 = vector.load %arg4[%c0_7, %c0_8] : memref<128x128xf32, #tpu.memory_space<vmem>>, vector<128x128xf32>
    %cst_9 = arith.constant dense<0.000000e+00> : vector<128x128xf32>
    %12 = tpu.matmul %11, %10, %cst_9 {dimension_numbers = #tpu.dot_dimension_numbers<[1], [0], [0], [1], [0, 0, 1, 1], [], []>} : vector<128x128xf32>, vector<128x128xf32>, vector<128x128xf32> -> vector<128x128xf32>
    %c0_10 = arith.constant 0 : index
    %c0_11 = arith.constant 0 : index
    %13 = vector.load %arg5[%c0_10, %c0_11] : memref<128x128xf32, #tpu.memory_space<vmem>>, vector<128x128xf32>
    tpu.vector_store %arg5[%c0_10, %c0_11], %12 {strides = array<i32>} : memref<128x128xf32, #tpu.memory_space<vmem>>, vector<128x128xf32>,
    return
  }
  func.func @transform_0(%arg0: i32) -> (i32, i32) {
    %c0_i32 = arith.constant 0 : i32
    %c0_i32_0 = arith.constant 0 : i32
    %c0_i32_1 = arith.constant 0 : i32
    return %c0_i32, %c0_i32_0 : i32, i32
  }
  func.func @transform_1(%arg0: i32) -> (i32, i32) {
    %c0_i32 = arith.constant 0 : i32
    %c0_i32_0 = arith.constant 0 : i32
    %c0_i32_1 = arith.constant 0 : i32
    return %c0_i32, %c0_i32_0 : i32, i32
  }
  func.func @transform_2(%arg0: i32) -> (i32, i32) {
    %c0_i32 = arith.constant 0 : i32
    %c0_i32_0 = arith.constant 0 : i32
    %c0_i32_1 = arith.constant 0 : i32
    return %c0_i32, %c0_i32_0 : i32, i32
  }
  func.func @transform_3(%arg0: i32) -> (i32, i32) {
    %c0_i32 = arith.constant 0 : i32
    %c0_i32_0 = arith.constant 0 : i32
    %c0_i32_1 = arith.constant 0 : i32
    return %c0_i32, %c0_i32_0 : i32, i32
  }
  func.func @transform_4(%arg0: i32) -> (i32, i32) {
    %c0_i32 = arith.constant 0 : i32
    %c0_i32_0 = arith.constant 0 : i32
    %c0_i32_1 = arith.constant 0 : i32
    return %c0_i32, %c0_i32_0 : i32, i32
  }
}

</mosaic_0001>

<bundles_post_ra>
// kernel: tpu_custom_call.1
= control target key start
LH: loop header
LB: loop body
LE: loop exit
PB: predicated region body
PF: predicated region fallthrough
CT: control target
= control target key end

     0   :  { %9 = vsyncpa [#allocation3], 0  ;;  %s946_s0 = inlined_call_operand.hbm [shape: f32[128,128], index: 0, kind: input, shape index: {}]   ;;  %s947_s1 = inlined_call_operand.hbm [shape: f32[128,128], index: 1, kind: input, shape index: {}]   ;;  %s948_s2 = inlined_call_operand.vmem [shape: f32[1,128], index: 2, kind: input, shape index: {}]   ;;  %s949_s3 = inlined_call_operand.hbm [shape: f32[128,128], index: 3, kind: input, shape index: {}]   ;;  %s950_s4 = inlined_call_operand.hbm [shape: f32[128,128], index: 4, kind: output, shape index: {}]  }
   0x1   :  { %10 = vsyncpa [#allocation6], 0 }
   0x2   :  { %11 = vsyncpa [#allocation4], 0  ;;  %s827_s15 = smov [#allocation5]   ;;  %s828_s17 = smov [#allocation2]  }
   0x3   :  { %s29_s16 = sshll.u32 %s827_s15, 4  ;;  %s17_s18 = sshll.u32 %s828_s17, 4  ;;  %s30_s16 = int_to_ptr.vmem [resolvable:$true] %s29_s16  ;;  %s858_s18 = int_to_ptr.vmem [resolvable:$true] %s17_s18 }
   0x4   :  { %s733_s21 = scalar_lea.hbm %s947_s1, 2048 }
   0x5   :  { %p734_p0 = scmp.ne.s32.totalorder %s947_s1, %s733_s21  ;;  %p737_p1 = scmp.lt.u32.totalorder %s733_s21, %s947_s1 }
   0x7   :  { %p739_p2 = pnand %p737_p1, %p734_p0 }
   0x9   :  { %742 = shalt.err (!%p739_p2)
}
   0xa   :  { %s743_s26 = scalar_lea.vmem %s30_s16, 2048  ;;  %p748_p4 = scmp.lt.s32.totalorder %s30_s16, %s30_s16 }
   0xb   :  { %p744_p3 = scmp.ne.s32.totalorder %s30_s16, %s743_s26  ;;  %p749_p5 = scmp.lt.s32.totalorder %s743_s26, %s743_s26 }
   0xd   :  { %p750_p6 = por %p749_p5, %p748_p4 }
   0xf   :  { %p751_p7 = pnand %p750_p6, %p744_p3 }
  0x11   :  { %754 = shalt.err (!%p751_p7)
}
  0x12   :  { %s829_s27 = smov 128   ;;  %s830_s28 = smov 8  }
  0x13   :  { %35 = dma.hbm_to_vmem [thread:$0]  %s947_s1, 2048, %s30_s16, [#allocation6], %s829_s27, %s829_s27, %s830_s28  }
  0x14   :  { %s755_s7 = scalar_lea.hbm %s946_s0, 2048 }
  0x15   :  { %p756_p8 = scmp.ne.s32.totalorder %s946_s0, %s755_s7  ;;  %p759_p9 = scmp.lt.u32.totalorder %s755_s7, %s946_s0 }
  0x17   :  { %p761_p10 = pnand %p759_p9, %p756_p8 }
  0x19   :  { %764 = shalt.err (!%p761_p10)
}
  0x1a   :  { %s765_s12 = scalar_lea.vmem %s858_s18, 2048  ;;  %p770_p12 = scmp.lt.s32.totalorder %s858_s18, %s858_s18 }
  0x1b   :  { %p766_p11 = scmp.ne.s32.totalorder %s858_s18, %s765_s12  ;;  %p771_p13 = scmp.lt.s32.totalorder %s765_s12, %s765_s12 }
  0x1d   :  { %p772_p0 = por %p771_p13, %p770_p12 }
  0x1f   :  { %p773_p1 = pnand %p772_p0, %p766_p11 }
  0x21   :  { %776 = shalt.err (!%p773_p1)
}
  0x22   :  { %23 = dma.hbm_to_vmem [thread:$0]  %s946_s0, 2048, %s858_s18, [#allocation3], %s829_s27, %s829_s27, %s830_s28  }
  0x23   :  { %s831_s14 = smov [#allocation7]   ;;  %s777_s19 = scalar_lea.hbm %s949_s3, 2048 }
  0x24   :  { %s43_s15 = sshll.u32 %s831_s14, 4  ;;  %p778_p2 = scmp.ne.s32.totalorder %s949_s3, %s777_s19  ;;  %s44_s15 = int_to_ptr.vmem [resolvable:$true] %s43_s15 }
  0x25   :  { %p781_p3 = scmp.lt.u32.totalorder %s777_s19, %s949_s3 }
  0x27   :  { %p783_p4 = pnand %p781_p3, %p778_p2 }
  0x29   :  { %786 = shalt.err (!%p783_p4)
}
  0x2a   :  { %s787_s24 = scalar_lea.vmem %s44_s15, 2048  ;;  %p792_p6 = scmp.lt.s32.totalorder %s44_s15, %s44_s15 }
  0x2b   :  { %p788_p5 = scmp.ne.s32.totalorder %s44_s15, %s787_s24  ;;  %p793_p7 = scmp.lt.s32.totalorder %s787_s24, %s787_s24 }
  0x2d   :  { %p794_p8 = por %p793_p7, %p792_p6 }
  0x2f   :  { %p795_p9 = pnand %p794_p8, %p788_p5 }
  0x31   :  { %798 = shalt.err (!%p795_p9)
}
  0x32   :  { %49 = dma.hbm_to_vmem [thread:$0]  %s949_s3, 2048, %s44_s15, [#allocation6], %s829_s27, %s829_s27, %s830_s28  }
  0x33   :  { %821 = dma.done.wait [#allocation3], 2048  }
  0x34   :  { %822 = vsyncadd [#allocation3], 4294965248 }
  0x35   :  { %823 = dma.done.wait [#allocation6], 4096  }
  0x36   :  { %824 = vsyncadd [#allocation6], 4294963200  ;;  %v75_v0 = vld [vmem:[#allocation5] sm:$0xff]  ;;  %v76_v1 = vld [vmem:[#allocation5 + $0x8] sm:$0xff] }
  0x37   :  { %v77_v2 = vld [vmem:[#allocation5 + $0x10] sm:$0xff]  ;;  %v663_v3 = vpack.c.bf16 %v76_v1, %v75_v0  ;;  %v78_v4 = vld [vmem:[#allocation5 + $0x18] sm:$0xff]  ;;  %v79_v6 = vld [vmem:[#allocation5 + $0x20] sm:$0xff] }
  0x38   :  { %v667_v5 = vpack.c.bf16 %v78_v4, %v77_v2  ;;  %v80_v7 = vld [vmem:[#allocation5 + $0x28] sm:$0xff]  ;;  %v59_v9 = vld [vmem:[#allocation2] sm:$0xff]  ;;  %v81_v10 = vld [vmem:[#allocation5 + $0x30] sm:$0xff] }
  0x39   :  { %664 = vmatprep.subr.bf16.mxu0 %v663_v3  ;;  %v671_v8 = vpack.c.bf16 %v80_v7, %v79_v6  ;;  %v82_v11 = vld [vmem:[#allocation5 + $0x38] sm:$0xff]  ;;  %583 = vmatprep.mubr.f32.mxu0 %v59_v9  ;;  %v83_v13 = vld [vmem:[#allocation5 + $0x40] sm:$0xff]  ;;  %v84_v14 = vld [vmem:[#allocation5 + $0x48] sm:$0xff] }
  0x3a   :  { %666 = vmatpush3.bf16.msra.mxu0 %v663_v3  ;;  %v675_v12 = vpack.c.bf16 %v82_v11, %v81_v10  ;;  %v679_v15 = vpack.c.bf16 %v84_v14, %v83_v13  ;;  %v85_v16 = vld [vmem:[#allocation5 + $0x50] sm:$0xff]  ;;  %v86_v17 = vld [vmem:[#allocation5 + $0x58] sm:$0xff]  ;;  %v87_v19 = vld [vmem:[#allocation5 + $0x60] sm:$0xff] }
  0x3b   :  { %668 = vmatprep.subr.bf16.mxu0 %v667_v5  ;;  %v683_v18 = vpack.c.bf16 %v86_v17, %v85_v16  ;;  %v88_v20 = vld [vmem:[#allocation5 + $0x68] sm:$0xff]  ;;  %v89_v22 = vld [vmem:[#allocation5 + $0x70] sm:$0xff]  ;;  %v90_v23 = vld [vmem:[#allocation5 + $0x78] sm:$0xff] }
  0x3c   :  { %v687_v21 = vpack.c.bf16 %v88_v20, %v87_v19  ;;  %v691_v24 = vpack.c.bf16 %v90_v23, %v89_v22  ;;  %v60_v25 = vld [vmem:[#allocation2 + $0x8] sm:$0xff]  ;;  %v61_v26 = vld [vmem:[#allocation2 + $0x10] sm:$0xff]  ;;  %v62_v27 = vld [vmem:[#allocation2 + $0x18] sm:$0xff] }
  0x3d   :  { %v63_v28 = vld [vmem:[#allocation2 + $0x20] sm:$0xff]  ;;  %v64_v29 = vld [vmem:[#allocation2 + $0x28] sm:$0xff]  ;;  %v65_v30 = vld [vmem:[#allocation2 + $0x30] sm:$0xff] }
  0x3e   :  { %670 = vmatpush3.bf16.msra.mxu0 %v667_v5  ;;  %v66_v31 = vld [vmem:[#allocation2 + $0x38] sm:$0xff]  ;;  %v67_v32 = vld [vmem:[#allocation2 + $0x40] sm:$0xff]  ;;  %v68_v33 = vld [vmem:[#allocation2 + $0x48] sm:$0xff] }
  0x3f   :  { %672 = vmatprep.subr.bf16.mxu0 %v671_v8  ;;  %v69_v34 = vld [vmem:[#allocation2 + $0x50] sm:$0xff]  ;;  %v70_v35 = vld [vmem:[#allocation2 + $0x58] sm:$0xff]  ;;  %v71_v36 = vld [vmem:[#allocation2 + $0x60] sm:$0xff] }
  0x40   :  { %v72_v37 = vld [vmem:[#allocation2 + $0x68] sm:$0xff]  ;;  %v73_v38 = vld [vmem:[#allocation2 + $0x70] sm:$0xff]  ;;  %v74_v39 = vld [vmem:[#allocation2 + $0x78] sm:$0xff] }
  0x41   :  { %v291_v40 = vld [vmem:[#allocation7] sm:$0xff] }
  0x42   :  { %674 = vmatpush3.bf16.msra.mxu0 %v671_v8  ;;  %639 = vmatprep.mubr.f32.mxu1 %v291_v40  ;;  %v913_v41 = vld [vmem:[%s948_s2] ss:$0 sm:$0xff]  ;;  %s832_s2 = smov [#allocation8]  }
  0x43   :  { %676 = vmatprep.subr.bf16.mxu0 %v675_v12  ;;  %s473_s26 = sshll.u32 %s832_s2, 4  ;;  %s474_s26 = int_to_ptr.vmem [resolvable:$true] %s473_s26 }
  0x44   :  { %s799_s29 = scalar_lea.vmem %s474_s26, 2048  ;;  %p804_p11 = scmp.lt.s32.totalorder %s474_s26, %s474_s26 }
  0x45   :  { %p800_p10 = scmp.ne.s32.totalorder %s474_s26, %s799_s29  ;;  %p805_p12 = scmp.lt.s32.totalorder %s799_s29, %s799_s29 }
  0x46   :  { %678 = vmatpush3.bf16.msra.mxu0 %v675_v12 }
  0x47   :  { %680 = vmatprep.subr.bf16.mxu0 %v679_v15  ;;  %p806_p13 = por %p805_p12, %p804_p11 }
  0x49   :  { %p807_p0 = pnand %p806_p13, %p800_p10 }
  0x4a   :  { %682 = vmatpush3.bf16.msra.mxu0 %v679_v15 }
  0x4b   :  { %684 = vmatprep.subr.bf16.mxu0 %v683_v18 }
  0x4e   :  { %686 = vmatpush3.bf16.msra.mxu0 %v683_v18 }
  0x4f   :  { %688 = vmatprep.subr.bf16.mxu0 %v687_v21 }
  0x52   :  { %690 = vmatpush3.bf16.msra.mxu0 %v687_v21 }
  0x53   :  { %692 = vmatprep.subr.bf16.mxu0 %v691_v24 }
  0x56   :  { %694 = vmatpush3.bf16.msra.mxu0 %v691_v24 }
  0x59   :  { %584 = vmatmul.mubr.f32.vlgmr.msra.gmra.mrb[0].mxu0 %v60_v25 }
  0x5a   :  { %586 = vmatprep.mubr.f32.mxu0 %v61_v26 }
  0x5d   :  { %587 = vmatmul.mubr.f32.gmra.mrb[2].mxu0 %v62_v27 }
  0x5e   :  { %589 = vmatprep.mubr.f32.mxu0 %v63_v28 }
  0x61   :  { %590 = vmatmul.mubr.f32.gmra.mrb[4].mxu0 %v64_v29 }
  0x62   :  { %592 = vmatprep.mubr.f32.mxu0 %v65_v30 }
  0x65   :  { %593 = vmatmul.mubr.f32.gmra.mrb[6].mxu0 %v66_v31 }
  0x66   :  { %595 = vmatprep.mubr.f32.mxu0 %v67_v32 }
  0x69   :  { %596 = vmatmul.mubr.f32.gmra.mrb[8].mxu0 %v68_v33 }
  0x6a   :  { %598 = vmatprep.mubr.f32.mxu0 %v69_v34 }
  0x6d   :  { %599 = vmatmul.mubr.f32.gmra.mrb[10].mxu0 %v70_v35 }
  0x6e   :  { %601 = vmatprep.mubr.f32.mxu0 %v71_v36 }
  0x71   :  { %602 = vmatmul.mubr.f32.gmra.mrb[12].mxu0 %v72_v37 }
  0x72   :  { %604 = vmatprep.mubr.f32.mxu0 %v73_v38 }
  0x75   :  { %605 = vmatmul.mubr.f32.gmra.mrb[14].mxu0 %v74_v39 }
 0x12c   :  { %v585_v42 = vpop.f32.mrb[0].mxu0 }
 0x12d   :  { %v170_v43 = vadd.f32 %v585_v42, %v913_v41  ;;  %v164_v44 = vpop.f32.mrb[1].mxu0 }
 0x12e   :  { %v165_v45 = vadd.f32 %v913_v41, %v164_v44 }
 0x12f   :  { %v260_v46 = vmul.f32 0.01, %v170_v43  ;;  %vm244_vm0 = vcmp.gt.f32.partialorder %v170_v43, 0.0 }
 0x130   :  { %v259_v47 = vmul.f32 0.01, %v165_v45  ;;  %v588_v48 = vpop.f32.mrb[2].mxu0  ;;  %vm243_vm1 = vcmp.gt.f32.partialorder %v165_v45, 0.0 }
 0x131   :  { %v180_v49 = vadd.f32 %v588_v48, %v913_v41  ;;  %v174_v50 = vpop.f32.mrb[3].mxu0  ;;  %v276_v51 = vsel %vm244_vm0, %v170_v43, %v260_v46 }
 0x132   :  { %v175_v52 = vadd.f32 %v913_v41, %v174_v50  ;;  %v275_v53 = vsel %vm243_vm1, %v165_v45, %v259_v47 }
 0x133   :  { %vm246_vm2 = vcmp.gt.f32.partialorder %v180_v49, 0.0  ;;  %v262_v54 = vmul.f32 0.01, %v180_v49  ;;  %v695_v55 = vpack.c.bf16 %v276_v51, %v275_v53  ;;  %v292_v51 = vld [vmem:[#allocation7 + $0x8] sm:$0xff]  ;;  %v294_v53 = vld [vmem:[#allocation7 + $0x18] sm:$0xff] }
 0x134   :  { %vm245_vm3 = vcmp.gt.f32.partialorder %v175_v52, 0.0  ;;  %v261_v56 = vmul.f32 0.01, %v175_v52  ;;  %v591_v57 = vpop.f32.mrb[4].mxu0 }
 0x135   :  { %v190_v58 = vadd.f32 %v591_v57, %v913_v41  ;;  %v184_v59 = vpop.f32.mrb[5].mxu0  ;;  %696 = vmatprep.subr.bf16.mxu1 %v695_v55  ;;  %v278_v60 = vsel %vm246_vm2, %v180_v49, %v262_v54  ;;  %v296_v54 = vld [vmem:[#allocation7 + $0x28] sm:$0xff]  ;;  %v299_v57 = vld [vmem:[#allocation7 + $0x40] sm:$0xff] }
 0x136   :  { %v185_v61 = vadd.f32 %v913_v41, %v184_v59  ;;  %698 = vmatpush3.bf16.msra.mxu1 %v695_v55  ;;  %v277_v62 = vsel %vm245_vm3, %v175_v52, %v261_v56  ;;  %v293_v52 = vld [vmem:[#allocation7 + $0x10] sm:$0xff]  ;;  %v298_v56 = vld [vmem:[#allocation7 + $0x38] sm:$0xff] }
 0x137   :  { %vm248_vm4 = vcmp.gt.f32.partialorder %v190_v58, 0.0  ;;  %v264_v63 = vmul.f32 0.01, %v190_v58  ;;  %v699_v0 = vpack.c.bf16 %v278_v60, %v277_v62  ;;  %v297_v55 = vld [vmem:[#allocation7 + $0x30] sm:$0xff]  ;;  %v302_v60 = vld [vmem:[#allocation7 + $0x58] sm:$0xff]  ;;  %v304_v62 = vld [vmem:[#allocation7 + $0x68] sm:$0xff] }
 0x138   :  { %vm247_vm5 = vcmp.gt.f32.partialorder %v185_v61, 0.0  ;;  %v263_v1 = vmul.f32 0.01, %v185_v61  ;;  %v594_v2 = vpop.f32.mrb[6].mxu0  ;;  %v301_v59 = vld [vmem:[#allocation7 + $0x50] sm:$0xff] }
 0x139   :  { %v200_v3 = vadd.f32 %v594_v2, %v913_v41  ;;  %v194_v4 = vpop.f32.mrb[7].mxu0  ;;  %700 = vmatprep.subr.bf16.mxu1 %v699_v0  ;;  %v280_v5 = vsel %vm248_vm4, %v190_v58, %v264_v63  ;;  %v300_v58 = vld [vmem:[#allocation7 + $0x48] sm:$0xff]  ;;  %v305_v63 = vld [vmem:[#allocation7 + $0x70] sm:$0xff] }
 0x13a   :  { %v195_v6 = vadd.f32 %v913_v41, %v194_v4  ;;  %702 = vmatpush3.bf16.msra.mxu1 %v699_v0  ;;  %v279_v7 = vsel %vm247_vm5, %v185_v61, %v263_v1  ;;  %v303_v61 = vld [vmem:[#allocation7 + $0x60] sm:$0xff]  ;;  %v306_v0 = vld [vmem:[#allocation7 + $0x78] sm:$0xff] }
 0x13b   :  { %vm250_vm6 = vcmp.gt.f32.partialorder %v200_v3, 0.0  ;;  %v266_v8 = vmul.f32 0.01, %v200_v3  ;;  %v703_v9 = vpack.c.bf16 %v280_v5, %v279_v7 }
 0x13c   :  { %vm249_vm7 = vcmp.gt.f32.partialorder %v195_v6, 0.0  ;;  %v265_v10 = vmul.f32 0.01, %v195_v6  ;;  %v597_v11 = vpop.f32.mrb[8].mxu0 }
 0x13d   :  { %v210_v12 = vadd.f32 %v597_v11, %v913_v41  ;;  %v204_v13 = vpop.f32.mrb[9].mxu0  ;;  %704 = vmatprep.subr.bf16.mxu1 %v703_v9  ;;  %v282_v14 = vsel %vm250_vm6, %v200_v3, %v266_v8 }
 0x13e   :  { %v205_v15 = vadd.f32 %v913_v41, %v204_v13  ;;  %706 = vmatpush3.bf16.msra.mxu1 %v703_v9  ;;  %v281_v16 = vsel %vm249_vm7, %v195_v6, %v265_v10 }
 0x13f   :  { %vm252_vm8 = vcmp.gt.f32.partialorder %v210_v12, 0.0  ;;  %v268_v17 = vmul.f32 0.01, %v210_v12  ;;  %v707_v18 = vpack.c.bf16 %v282_v14, %v281_v16 }
 0x140   :  { %vm251_vm9 = vcmp.gt.f32.partialorder %v205_v15, 0.0  ;;  %v267_v19 = vmul.f32 0.01, %v205_v15  ;;  %v600_v20 = vpop.f32.mrb[10].mxu0 }
 0x141   :  { %v220_v21 = vadd.f32 %v600_v20, %v913_v41  ;;  %v214_v22 = vpop.f32.mrb[11].mxu0  ;;  %708 = vmatprep.subr.bf16.mxu1 %v707_v18  ;;  %v284_v23 = vsel %vm252_vm8, %v210_v12, %v268_v17 }
 0x142   :  { %v215_v24 = vadd.f32 %v913_v41, %v214_v22  ;;  %710 = vmatpush3.bf16.msra.mxu1 %v707_v18  ;;  %v283_v25 = vsel %vm251_vm9, %v205_v15, %v267_v19 }
 0x143   :  { %vm254_vm10 = vcmp.gt.f32.partialorder %v220_v21, 0.0  ;;  %v270_v26 = vmul.f32 0.01, %v220_v21  ;;  %v711_v27 = vpack.c.bf16 %v284_v23, %v283_v25 }
 0x144   :  { %vm253_vm11 = vcmp.gt.f32.partialorder %v215_v24, 0.0  ;;  %v269_v28 = vmul.f32 0.01, %v215_v24  ;;  %v603_v29 = vpop.f32.mrb[12].mxu0 }
 0x145   :  { %v230_v30 = vadd.f32 %v603_v29, %v913_v41  ;;  %v224_v31 = vpop.f32.mrb[13].mxu0  ;;  %712 = vmatprep.subr.bf16.mxu1 %v711_v27  ;;  %v286_v32 = vsel %vm254_vm10, %v220_v21, %v270_v26 }
 0x146   :  { %v225_v33 = vadd.f32 %v913_v41, %v224_v31  ;;  %714 = vmatpush3.bf16.msra.mxu1 %v711_v27  ;;  %v285_v34 = vsel %vm253_vm11, %v215_v24, %v269_v28 }
 0x147   :  { %vm256_vm12 = vcmp.gt.f32.partialorder %v230_v30, 0.0  ;;  %v272_v35 = vmul.f32 0.01, %v230_v30  ;;  %v715_v36 = vpack.c.bf16 %v286_v32, %v285_v34 }
 0x148   :  { %vm255_vm13 = vcmp.gt.f32.partialorder %v225_v33, 0.0  ;;  %v271_v37 = vmul.f32 0.01, %v225_v33  ;;  %v606_v38 = vpop.f32.mrb[14].mxu0 }
 0x149   :  { %v240_v39 = vadd.f32 %v606_v38, %v913_v41  ;;  %v234_v40 = vpop.f32.mrb[15].mxu0  ;;  %716 = vmatprep.subr.bf16.mxu1 %v715_v36  ;;  %v288_v42 = vsel %vm256_vm12, %v230_v30, %v272_v35 }
 0x14a   :  { %v235_v43 = vadd.f32 %v913_v41, %v234_v40  ;;  %718 = vmatpush3.bf16.msra.mxu1 %v715_v36  ;;  %v287_v44 = vsel %vm255_vm13, %v225_v33, %v271_v37  ;;  %v295_v41 = vld [vmem:[#allocation7 + $0x20] sm:$0xff] }
 0x14b   :  { %vm258_vm14 = vcmp.gt.f32.partialorder %v240_v39, 0.0  ;;  %v274_v45 = vmul.f32 0.01, %v240_v39  ;;  %v719_v46 = vpack.c.bf16 %v288_v42, %v287_v44 }
 0x14c   :  { %vm257_vm15 = vcmp.gt.f32.partialorder %v235_v43, 0.0  ;;  %v273_v47 = vmul.f32 0.01, %v235_v43 }
 0x14d   :  { %720 = vmatprep.subr.bf16.mxu1 %v719_v46  ;;  %v290_v48 = vsel %vm258_vm14, %v240_v39, %v274_v45 }
 0x14e   :  { %722 = vmatpush3.bf16.msra.mxu1 %v719_v46  ;;  %v289_v49 = vsel %vm257_vm15, %v235_v43, %v273_v47 }
 0x14f   :  { %v723_v50 = vpack.c.bf16 %v290_v48, %v289_v49 }
 0x151   :  { %724 = vmatprep.subr.bf16.mxu1 %v723_v50 }
 0x152   :  { %726 = vmatpush3.bf16.msra.mxu1 %v723_v50 }
 0x155   :  { %640 = vmatmul.mubr.f32.vlgmr.msra.gmra.mrb[0].mxu1 %v292_v51 }
 0x156   :  { %642 = vmatprep.mubr.f32.mxu1 %v293_v52 }
 0x159   :  { %643 = vmatmul.mubr.f32.gmra.mrb[2].mxu1 %v294_v53 }
 0x15a   :  { %645 = vmatprep.mubr.f32.mxu1 %v295_v41 }
 0x15d   :  { %646 = vmatmul.mubr.f32.gmra.mrb[4].mxu1 %v296_v54 }
 0x15e   :  { %648 = vmatprep.mubr.f32.mxu1 %v297_v55 }
 0x161   :  { %649 = vmatmul.mubr.f32.gmra.mrb[6].mxu1 %v298_v56 }
 0x162   :  { %651 = vmatprep.mubr.f32.mxu1 %v299_v57 }
 0x165   :  { %652 = vmatmul.mubr.f32.gmra.mrb[8].mxu1 %v300_v58 }
 0x166   :  { %654 = vmatprep.mubr.f32.mxu1 %v301_v59 }
 0x169   :  { %655 = vmatmul.mubr.f32.gmra.mrb[10].mxu1 %v302_v60 }
 0x16a   :  { %657 = vmatprep.mubr.f32.mxu1 %v303_v61 }
 0x16d   :  { %658 = vmatmul.mubr.f32.gmra.mrb[12].mxu1 %v304_v62 }
 0x16e   :  { %660 = vmatprep.mubr.f32.mxu1 %v305_v63 }
 0x171   :  { %661 = vmatmul.mubr.f32.gmra.mrb[14].mxu1 %v306_v0 }
 0x228   :  { %v641_v1 = vpop.f32.mrb[0].mxu1 }
 0x229   :  { %453 = vst [vmem:[#allocation8 + $0x8] sm:$0xff] %v641_v1  ;;  %v373_v2 = vpop.f32.mrb[1].mxu1 }
 0x22a   :  { %452 = vst [vmem:[#allocation8] sm:$0xff] %v373_v2 }
 0x22c   :  { %v644_v3 = vpop.f32.mrb[2].mxu1 }
 0x22d   :  { %455 = vst [vmem:[#allocation8 + $0x18] sm:$0xff] %v644_v3  ;;  %v383_v4 = vpop.f32.mrb[3].mxu1 }
 0x22e   :  { %454 = vst [vmem:[#allocation8 + $0x10] sm:$0xff] %v383_v4 }
 0x230   :  { %v647_v5 = vpop.f32.mrb[4].mxu1 }
 0x231   :  { %457 = vst [vmem:[#allocation8 + $0x28] sm:$0xff] %v647_v5  ;;  %v393_v6 = vpop.f32.mrb[5].mxu1 }
 0x232   :  { %456 = vst [vmem:[#allocation8 + $0x20] sm:$0xff] %v393_v6 }
 0x234   :  { %v650_v7 = vpop.f32.mrb[6].mxu1 }
 0x235   :  { %459 = vst [vmem:[#allocation8 + $0x38] sm:$0xff] %v650_v7  ;;  %v403_v8 = vpop.f32.mrb[7].mxu1 }
 0x236   :  { %458 = vst [vmem:[#allocation8 + $0x30] sm:$0xff] %v403_v8 }
 0x238   :  { %v653_v9 = vpop.f32.mrb[8].mxu1 }
 0x239   :  { %461 = vst [vmem:[#allocation8 + $0x48] sm:$0xff] %v653_v9  ;;  %v413_v10 = vpop.f32.mrb[9].mxu1 }
 0x23a   :  { %460 = vst [vmem:[#allocation8 + $0x40] sm:$0xff] %v413_v10 }
 0x23c   :  { %v656_v11 = vpop.f32.mrb[10].mxu1 }
 0x23d   :  { %463 = vst [vmem:[#allocation8 + $0x58] sm:$0xff] %v656_v11  ;;  %v423_v12 = vpop.f32.mrb[11].mxu1 }
 0x23e   :  { %462 = vst [vmem:[#allocation8 + $0x50] sm:$0xff] %v423_v12 }
 0x240   :  { %v659_v13 = vpop.f32.mrb[12].mxu1 }
 0x241   :  { %465 = vst [vmem:[#allocation8 + $0x68] sm:$0xff] %v659_v13  ;;  %v433_v14 = vpop.f32.mrb[13].mxu1 }
 0x242   :  { %464 = vst [vmem:[#allocation8 + $0x60] sm:$0xff] %v433_v14 }
 0x244   :  { %v662_v15 = vpop.f32.mrb[14].mxu1 }
 0x245   :  { %467 = vst [vmem:[#allocation8 + $0x78] sm:$0xff] %v662_v15  ;;  %v443_v16 = vpop.f32.mrb[15].mxu1 }
 0x246   :  { %466 = vst [vmem:[#allocation8 + $0x70] sm:$0xff] %v443_v16 }
 0x247   :  { %810 = shalt.err (!%p807_p0)
}
 0x248   :  { %s811_s6 = scalar_lea.hbm %s950_s4, 2048 }
 0x249   :  { %p812_p1 = scmp.ne.s32.totalorder %s950_s4, %s811_s6  ;;  %p815_p2 = scmp.lt.u32.totalorder %s811_s6, %s950_s4 }
 0x24b   :  { %p817_p3 = pnand %p815_p2, %p812_p1 }
 0x24d   :  { %820 = shalt.err (!%p817_p3)
}
 0x24e   :  { %479 = dma.vmem_to_hbm [thread:$0]  %s474_s26, 2048, %s950_s4, [#allocation4], %s829_s27, %s829_s27, %s830_s28  }
 0x24f   :  { %825 = dma.done.wait [#allocation4], 2048  }
 0x250   :  { %826 = vsyncadd [#allocation4], 4294965248 }
 0x251   :  { %483 = vsyncpa [#allocation3], 1 }
 0x252   :  { %484 = vsyncpa [#allocation6], 1 }
 0x253   :  { %485 = vsyncpa [#allocation4], 1 }

</bundles_post_ra>
